<compile_context>
chip_gen: v6e
topology: v6e:2x2x1
jax: 0.10.0
libtpu: 0.0.40
codegen_flags: <defaults>
</compile_context>

<pallas_src>
import functools

import jax
import jax.numpy as jnp
from jax.experimental import pallas as pl
from jax.experimental.pallas import tpu as pltpu


def _round_up(x, m):
    return (x + m - 1) // m * m


def _tpu_kind():
    try:
        return jax.devices()[0].device_kind.lower()
    except Exception:
        return ""


def _pick_tb(B, kind, b_cap):
    """B-tile pick. Prefer TB == B (x/batch streamed exactly once); split only
    for v7x megacore sharding or to bound one-hot/vreg pressure on v5e."""
    if ("v7" in kind or "7x" in kind) and B >= 16:
        # nb >= 2 so the "parallel" bi axis actually shards across the two
        # v7x TensorCores. Re-streaming x twice is fine: the scatter loop is
        # overhead/VALU bound, not HBM bound.
        return min(_round_up(pl.cdiv(B, 2), 8), _round_up(b_cap, 8))
    if "v5" in kind:
        # Single vst slot + 128-wide MXU: keep the (TB, TN) one-hot small.
        return B if B <= 128 else 128
    return B if B <= b_cap else _round_up(b_cap, 8)


def _global_model_kernel(batch_ref, xaug_ref, u_ref,
                         w1u_ref, w1x_ref, b1_ref,
                         w2_ref, b2_ref,
                         w3_ref, b3_ref,
                         out_ref,
                         acc_ref,
                         *, scatter_precision):
    bi = pl.program_id(0)            # B-tile index (parallel)
    k = pl.program_id(1)             # N-tile index (reduction, innermost)
    nk = pl.num_programs(1)

    TB = u_ref.shape[0]
    Fx = w1x_ref.shape[0]            # node-feature width (x_aug has Fx+1 cols)

    @pl.when(k == 0)
    def _init():
        acc_ref[...] = jnp.zeros_like(acc_ref)

    # ---- streamed one-hot scatter-add: a single fused MXU pass per tile ----
    # x_aug = [x | 1]: columns [:Fx] accumulate feature sums, column Fx the
    # node counts. Padded tail rows are all-zero (and carry batch id -1), so
    # they contribute nothing - no masking work in the hot loop.
    x_tile = xaug_ref[...]                                         # (TN, Fx+1)
    batch_row = batch_ref[...]                                     # (1, TN) int32
    row_col = bi * TB + jax.lax.broadcasted_iota(jnp.int32, (TB, 1), 0)
    onehot = (row_col == batch_row).astype(x_tile.dtype)           # (TB, TN)
    acc_ref[...] += jnp.dot(onehot, x_tile,
                            preferred_element_type=jnp.float32,
                            precision=scatter_precision)           # (TB, Fx+1)

    # ---- final N step: tiny MLP epilogue, single output write ----
    @pl.when(k == nk - 1)
    def _finalize():
        acc = acc_ref[...]
        sums = acc[:, :Fx]                                         # (TB, Fx)
        counts = jnp.maximum(acc[:, Fx:Fx + 1], 1.0)               # (TB, 1)
        mean_x = sums / counts                                     # exact f32 div
        u = u_ref[...].astype(jnp.float32)

        hi = jax.lax.Precision.HIGHEST
        # cat([u, mean_x]) @ W1  ==  u @ W1_u + mean_x @ W1_x
        h1 = (jnp.dot(u, w1u_ref[...],
                      preferred_element_type=jnp.float32, precision=hi)
              + jnp.dot(mean_x, w1x_ref[...],
                        preferred_element_type=jnp.float32, precision=hi)
              + b1_ref[...])
        h1 = jnp.maximum(h1, 0.0)

        h2 = jnp.dot(h1, w2_ref[...],
                     preferred_element_type=jnp.float32, precision=hi) + b2_ref[...]
        h2 = jnp.maximum(h2, 0.0)

        out = jnp.dot(h2, w3_ref[...],
                      preferred_element_type=jnp.float32, precision=hi) + b3_ref[...]
        out_ref[...] = out.astype(out_ref.dtype)


def prepare_kernel_params(params, num_global_attr):
    """One-time weight prep (transpose / split / reshape / cast).

    Hoisted out of the per-call path so the hot path emits only the
    pallas_call. PyTorch Linear stores W as [out, in]; the kernel consumes
    [in, out], split at the concat boundary: cat([u, mean_x]) @ W1 becomes
    u @ W1_u + mean_x @ W1_x.
    """
    Fu = num_global_attr
    w1_t = jnp.asarray(params["w1"], jnp.float32).T        # [Fu+Fx, 2h]
    return {
        "w1u": w1_t[:Fu, :],
        "w1x": w1_t[Fu:, :],
        "b1": jnp.asarray(params["b1"], jnp.float32).reshape(1, -1),
        "w2": jnp.asarray(params["w2"], jnp.float32).T,
        "b2": jnp.asarray(params["b2"], jnp.float32).reshape(1, -1),
        "w3": jnp.asarray(params["w3"], jnp.float32).T,
        "b3": jnp.asarray(params["b3"], jnp.float32).reshape(1, -1),
    }


def global_model_forward(x, edge_index, edge_attr, u, batch, kparams,
                         *, n_tile=2048, b_tile=256):
    """Pallas implementation of Global_Model.forward.

    edge_index / edge_attr are accepted for signature parity but are unused
    (exactly as in the PyTorch module's forward).
    """
    del edge_index, edge_attr  # unused by the reference forward

    N, Fx = x.shape
    B, Fu = u.shape
    H1 = kparams["w1u"].shape[1]
    H2 = kparams["w2"].shape[1]
    Fxa = Fx + 1

    kind = _tpu_kind()

    # --- N tiling: large tiles so per-grid-step overhead (~0.35us) doesn't
    #     dominate when Fx is tiny; tail is padded wrapper-side. ---
    if N <= n_tile:
        TN = _round_up(max(N, 8), 8)          # single tile = full (padded) extent
    else:
        TN = n_tile                            # multiple of 128 (lane constraint)
    nk = pl.cdiv(N, TN)
    N_pad = nk * TN

    # --- B tiling (generation-aware). ---
    TB = _pick_tb(B, kind, b_tile)
    nb = pl.cdiv(B, TB)
    B_pad = nb * TB

    # Wrapper-side prep: the ones column fuses the count matmul into the
    # feature matmul; zero rows + sentinel -1 ids make padded nodes inert.
    x_aug = jnp.concatenate([x, jnp.ones((N, 1), dtype=x.dtype)], axis=1)
    batch_i32 = batch.astype(jnp.int32)
    if N_pad != N:
        x_aug = jnp.pad(x_aug, ((0, N_pad - N), (0, 0)))
        batch_i32 = jnp.pad(batch_i32, (0, N_pad - N), constant_values=-1)
    batch_2d = batch_i32.reshape(1, N_pad)

    # Zero-pad u so the epilogue never computes on uninitialized VMEM rows
    # when B is not a multiple of TB; slice the output back afterwards.
    u_in = jnp.pad(u, ((0, B_pad - B), (0, 0))) if B_pad != B else u

    # Explicit dtype/precision decision: f32 x -> HIGHEST (accurate sums,
    # one-hot is exactly representable); bf16 x -> native single-pass MXU.
    scatter_precision = (jax.lax.Precision.HIGHEST
                         if x.dtype == jnp.float32 else jax.lax.Precision.DEFAULT)
    kernel = functools.partial(_global_model_kernel,
                               scatter_precision=scatter_precision)

    grid_spec = pltpu.PrefetchScalarGridSpec(
        num_scalar_prefetch=0,
        grid=(nb, nk),
        in_specs=[
            pl.BlockSpec((1, TN), lambda bi, k: (0, k)),      # batch ids (streamed)
            pl.BlockSpec((TN, Fxa), lambda bi, k: (k, 0)),    # x_aug (streamed)
            pl.BlockSpec((TB, Fu), lambda bi, k: (bi, 0)),    # u (per B tile, resident)
            pl.BlockSpec((Fu, H1), lambda bi, k: (0, 0)),     # w1_u
            pl.BlockSpec((Fx, H1), lambda bi, k: (0, 0)),     # w1_x
            pl.BlockSpec((1, H1), lambda bi, k: (0, 0)),      # b1
            pl.BlockSpec((H1, H2), lambda bi, k: (0, 0)),     # w2
            pl.BlockSpec((1, H2), lambda bi, k: (0, 0)),      # b2
            pl.BlockSpec((H2, Fu), lambda bi, k: (0, 0)),     # w3
            pl.BlockSpec((1, Fu), lambda bi, k: (0, 0)),      # b3
        ],
        out_specs=pl.BlockSpec((TB, Fu), lambda bi, k: (bi, 0)),
        scratch_shapes=[pltpu.VMEM((TB, Fxa), jnp.float32)],  # fused sums+counts
    )

    out = pl.pallas_call(
        kernel,
        out_shape=jax.ShapeDtypeStruct((B_pad, Fu), jnp.float32),
        grid_spec=grid_spec,
        compiler_params=pltpu.CompilerParams(
            dimension_semantics=("parallel", "arbitrary"),
            vmem_limit_bytes=32 * 1024 * 1024),
    )(batch_2d, x_aug, u_in,
      kparams["w1u"], kparams["w1x"], kparams["b1"],
      kparams["w2"], kparams["b2"],
      kparams["w3"], kparams["b3"])

    return out[:B] if B_pad != B else out


def init_params(key, num_node_attr, num_global_attr, hiddens):
    """Deterministic init matching the nn.Linear shapes in __init__."""
    in_channels = num_node_attr + num_global_attr
    out_channels = num_global_attr
    ks = jax.random.split(key, 6)

    def lin(kw, kb, fan_in, fan_out):
        bound = 1.0 / jnp.sqrt(jnp.float32(fan_in))
        w = jax.random.uniform(kw, (fan_out, fan_in), jnp.float32, -bound, bound)
        b = jax.random.uniform(kb, (fan_out,), jnp.float32, -bound, bound)
        return w, b

    w1, b1 = lin(ks[0], ks[1], in_channels, 2 * hiddens)
    w2, b2 = lin(ks[2], ks[3], 2 * hiddens, 3 * hiddens)
    w3, b3 = lin(ks[4], ks[5], 3 * hiddens, out_channels)
    return {"w1": w1, "b1": b1, "w2": w2, "b2": b2, "w3": w3, "b3": b3}


def _reference_forward(x, u, batch, params):
    """Plain-JAX reference (f32-accurate matmuls) for sanity checking."""
    B = u.shape[0]
    hi = jax.lax.Precision.HIGHEST
    onehot = (jnp.arange(B)[:, None] == batch[None, :]).astype(jnp.float32)
    sums = jnp.dot(onehot, x, precision=hi)
    counts = jnp.maximum(onehot.sum(axis=1, keepdims=True), 1.0)
    mean_x = sums / counts
    h = jnp.concatenate([u, mean_x], axis=1)
    h = jnp.maximum(jnp.dot(h, params["w1"].T, precision=hi) + params["b1"], 0.0)
    h = jnp.maximum(jnp.dot(h, params["w2"].T, precision=hi) + params["b2"], 0.0)
    return jnp.dot(h, params["w3"].T, precision=hi) + params["b3"]


if __name__ == "__main__":
    num_node_attr = 4      # F_x
    num_edge_attr = 5      # F_e (unused in forward)
    num_global_attr = 3    # F_u
    hiddens = 8

    key = jax.random.PRNGKey(0)
    k_params, k_small, k_big = jax.random.split(key, 3)

    params = init_params(k_params, num_node_attr, num_global_attr, hiddens)
    kparams = prepare_kernel_params(params, num_global_attr)   # one-time prep

    def make_inputs(k, N, E, B):
        kx, ku, ke, ki, kb = jax.random.split(k, 5)
        x = jax.random.normal(kx, (N, num_node_attr), jnp.float32)
        u = jax.random.normal(ku, (B, num_global_attr), jnp.float32)
        edge_attr = jax.random.normal(ke, (E, num_edge_attr), jnp.float32)
        edge_index = jax.random.randint(ki, (2, E), 0, N, jnp.int32)
        batch = jnp.sort(jax.random.randint(kb, (N,), 0, B, jnp.int32))
        return x, edge_index, edge_attr, u, batch

    # --- small case (single tile in both axes) ---
    x, ei, ea, u, batch = make_inputs(k_small, N=10, E=12, B=2)
    out = jax.block_until_ready(global_model_forward(x, ei, ea, u, batch, kparams))
    ref = _reference_forward(x, u, batch, params)
    assert out.shape == (2, num_global_attr)
    assert jnp.allclose(out, ref, atol=1e-4, rtol=1e-4), "small case mismatch"

    # --- larger case: exercises the tiled N reduction + wrapper-side padding ---
    x, ei, ea, u, batch = make_inputs(k_big, N=2500, E=40, B=8)
    out = jax.block_until_ready(global_model_forward(x, ei, ea, u, batch, kparams))
    ref = _reference_forward(x, u, batch, params)
    assert out.shape == (8, num_global_attr)
    assert jnp.allclose(out, ref, atol=1e-4, rtol=1e-4), "tiled case mismatch"

    print("KERNEL_OK")
</pallas_src>

<mosaic_0001>
module attributes {stable_mosaic.version = 11 : i64} {
  func.func @_global_model_kernel(%arg0: i32, %arg1: i32, %arg2: memref<1x16xi32, #tpu.memory_space<vmem>>, %arg3: memref<16x5xf32, #tpu.memory_space<vmem>>, %arg4: memref<2x3xf32, #tpu.memory_space<vmem>>, %arg5: memref<3x16xf32, #tpu.memory_space<vmem>>, %arg6: memref<4x16xf32, #tpu.memory_space<vmem>>, %arg7: memref<1x16xf32, #tpu.memory_space<vmem>>, %arg8: memref<16x24xf32, #tpu.memory_space<vmem>>, %arg9: memref<1x24xf32, #tpu.memory_space<vmem>>, %arg10: memref<24x3xf32, #tpu.memory_space<vmem>>, %arg11: memref<1x3xf32, #tpu.memory_space<vmem>>, %arg12: memref<2x3xf32, #tpu.memory_space<vmem>>, %arg13: memref<2x5xf32, #tpu.memory_space<vmem>>) attributes {dimension_semantics = [#tpu.dimension_semantics<parallel>, #tpu.dimension_semantics<arbitrary>], iteration_bounds = array<i64: 1, 1>, scalar_prefetch = 0 : i64, scratch_operands = 1 : i64, tpu.core_type = #tpu.core_type<tc>, window_params = [{transform_indices = @transform_0, window_bounds = array<i64: 1, 16>}, {transform_indices = @transform_1, window_bounds = array<i64: 16, 5>}, {transform_indices = @transform_2, window_bounds = array<i64: 2, 3>}, {pipeline_mode = #tpu.pipeline_mode<synchronous>, transform_indices = @transform_3, window_bounds = array<i64: 3, 16>}, {pipeline_mode = #tpu.pipeline_mode<synchronous>, transform_indices = @transform_4, window_bounds = array<i64: 4, 16>}, {pipeline_mode = #tpu.pipeline_mode<synchronous>, transform_indices = @transform_5, window_bounds = array<i64: 1, 16>}, {pipeline_mode = #tpu.pipeline_mode<synchronous>, transform_indices = @transform_6, window_bounds = array<i64: 16, 24>}, {pipeline_mode = #tpu.pipeline_mode<synchronous>, transform_indices = @transform_7, window_bounds = array<i64: 1, 24>}, {pipeline_mode = #tpu.pipeline_mode<synchronous>, transform_indices = @transform_8, window_bounds = array<i64: 24, 3>}, {pipeline_mode = #tpu.pipeline_mode<synchronous>, transform_indices = @transform_9, window_bounds = array<i64: 1, 3>}, {transform_indices = @transform_10, window_bounds = array<i64: 2, 3>}]} {
    %c0_i32 = arith.constant 0 : i32
    %0 = arith.cmpi eq, %arg1, %c0_i32 : i32
    %1 = arith.extui %0 : i1 to i32
    %c0_i32_0 = arith.constant 0 : i32
    %2 = arith.cmpi ne, %1, %c0_i32_0 : i32
    scf.if %2 {
      %cst_10 = arith.constant 0.000000e+00 : f32
      %21 = vector.broadcast %cst_10 : f32 to vector<2x5xf32>
      %c0_11 = arith.constant 0 : index
      %c0_12 = arith.constant 0 : index
      %22 = vector.load %arg13[%c0_11, %c0_12] : memref<2x5xf32, #tpu.memory_space<vmem>>, vector<2x5xf32>
      tpu.vector_store %arg13[%c0_11, %c0_12], %21 {strides = array<i32>} : memref<2x5xf32, #tpu.memory_space<vmem>>, vector<2x5xf32>,
    } else {
    }
    %c0 = arith.constant 0 : index
    %c0_1 = arith.constant 0 : index
    %3 = vector.load %arg3[%c0, %c0_1] : memref<16x5xf32, #tpu.memory_space<vmem>>, vector<16x5xf32>
    %c0_2 = arith.constant 0 : index
    %c0_3 = arith.constant 0 : index
    %4 = vector.load %arg2[%c0_2, %c0_3] : memref<1x16xi32, #tpu.memory_space<vmem>>, vector<1x16xi32>
    %c2_i32 = arith.constant 2 : i32
    %5 = arith.muli %arg0, %c2_i32 : i32
    %6 = tpu.iota {dimensions = array<i32: 0>} : vector<2x1xi32>
    %7 = vector.broadcast %5 : i32 to vector<2x1xi32>
    %8 = arith.addi %7, %6 : vector<2x1xi32>
    %9 = vector.broadcast %8 : vector<2x1xi32> to vector<2x16xi32>
    %10 = vector.broadcast %4 : vector<1x16xi32> to vector<2x16xi32>
    %11 = arith.cmpi eq, %9, %10 : vector<2x16xi32>
    %12 = arith.extui %11 : vector<2x16xi1> to vector<2x16xi32>
    %13 = arith.sitofp %12 : vector<2x16xi32> to vector<2x16xf32>
    %c0_4 = arith.constant 0 : index
    %c0_5 = arith.constant 0 : index
    %14 = vector.load %arg13[%c0_4, %c0_5] : memref<2x5xf32, #tpu.memory_space<vmem>>, vector<2x5xf32>
    %cst = arith.constant dense<0.000000e+00> : vector<2x5xf32>
    %15 = tpu.matmul %13, %3, %cst {dimension_numbers = #tpu.dot_dimension_numbers<[1], [0], [0], [1], [0, 0, 1, 1], [], []>, precision = #tpu.contract_precision<fp32>} : vector<2x16xf32>, vector<16x5xf32>, vector<2x5xf32> -> vector<2x5xf32>
    %16 = arith.addf %14, %15 : vector<2x5xf32>
    %c0_6 = arith.constant 0 : index
    %c0_7 = arith.constant 0 : index
    %17 = vector.load %arg13[%c0_6, %c0_7] : memref<2x5xf32, #tpu.memory_space<vmem>>, vector<2x5xf32>
    tpu.vector_store %arg13[%c0_6, %c0_7], %16 {strides = array<i32>} : memref<2x5xf32, #tpu.memory_space<vmem>>, vector<2x5xf32>,
    %c0_i32_8 = arith.constant 0 : i32
    %18 = arith.cmpi eq, %arg1, %c0_i32_8 : i32
    %19 = arith.extui %18 : i1 to i32
    %c0_i32_9 = arith.constant 0 : i32
    %20 = arith.cmpi ne, %19, %c0_i32_9 : i32
    scf.if %20 {
      %c0_10 = arith.constant 0 : index
      %c0_11 = arith.constant 0 : index
      %21 = vector.load %arg13[%c0_10, %c0_11] : memref<2x5xf32, #tpu.memory_space<vmem>>, vector<2x5xf32>
      %22 = vector.extract_strided_slice %21 {offsets = [0, 0], sizes = [2, 4], strides = [1, 1]} : vector<2x5xf32> to vector<2x4xf32>
      %23 = vector.extract_strided_slice %21 {offsets = [0, 4], sizes = [2, 1], strides = [1, 1]} : vector<2x5xf32> to vector<2x1xf32>
      %cst_12 = arith.constant 1.000000e+00 : f32
      %24 = vector.broadcast %cst_12 : f32 to vector<2x1xf32>
      %25 = arith.maximumf %23, %24 : vector<2x1xf32>
      %26 = vector.broadcast %25 : vector<2x1xf32> to vector<2x4xf32>
      %27 = arith.divf %22, %26 : vector<2x4xf32>
      %c0_13 = arith.constant 0 : index
      %c0_14 = arith.constant 0 : index
      %28 = vector.load %arg4[%c0_13, %c0_14] : memref<2x3xf32, #tpu.memory_space<vmem>>, vector<2x3xf32>
      %c0_15 = arith.constant 0 : index
      %c0_16 = arith.constant 0 : index
      %29 = vector.load %arg5[%c0_15, %c0_16] : memref<3x16xf32, #tpu.memory_space<vmem>>, vector<3x16xf32>
      %cst_17 = arith.constant dense<0.000000e+00> : vector<2x16xf32>
      %30 = tpu.matmul %28, %29, %cst_17 {dimension_numbers = #tpu.dot_dimension_numbers<[1], [0], [0], [1], [0, 0, 1, 1], [], []>, precision = #tpu.contract_precision<fp32>} : vector<2x3xf32>, vector<3x16xf32>, vector<2x16xf32> -> vector<2x16xf32>
      %c0_18 = arith.constant 0 : index
      %c0_19 = arith.constant 0 : index
      %31 = vector.load %arg6[%c0_18, %c0_19] : memref<4x16xf32, #tpu.memory_space<vmem>>, vector<4x16xf32>
      %cst_20 = arith.constant dense<0.000000e+00> : vector<2x16xf32>
      %32 = tpu.matmul %27, %31, %cst_20 {dimension_numbers = #tpu.dot_dimension_numbers<[1], [0], [0], [1], [0, 0, 1, 1], [], []>, precision = #tpu.contract_precision<fp32>} : vector<2x4xf32>, vector<4x16xf32>, vector<2x16xf32> -> vector<2x16xf32>
      %33 = arith.addf %30, %32 : vector<2x16xf32>
      %c0_21 = arith.constant 0 : index
      %c0_22 = arith.constant 0 : index
      %34 = vector.load %arg7[%c0_21, %c0_22] : memref<1x16xf32, #tpu.memory_space<vmem>>, vector<1x16xf32>
      %35 = vector.broadcast %34 : vector<1x16xf32> to vector<2x16xf32>
      %36 = arith.addf %33, %35 : vector<2x16xf32>
      %cst_23 = arith.constant 0.000000e+00 : f32
      %37 = vector.broadcast %cst_23 : f32 to vector<2x16xf32>
      %38 = arith.maximumf %36, %37 : vector<2x16xf32>
      %c0_24 = arith.constant 0 : index
      %c0_25 = arith.constant 0 : index
      %39 = vector.load %arg8[%c0_24, %c0_25] : memref<16x24xf32, #tpu.memory_space<vmem>>, vector<16x24xf32>
      %cst_26 = arith.constant dense<0.000000e+00> : vector<2x24xf32>
      %40 = tpu.matmul %38, %39, %cst_26 {dimension_numbers = #tpu.dot_dimension_numbers<[1], [0], [0], [1], [0, 0, 1, 1], [], []>, precision = #tpu.contract_precision<fp32>} : vector<2x16xf32>, vector<16x24xf32>, vector<2x24xf32> -> vector<2x24xf32>
      %c0_27 = arith.constant 0 : index
      %c0_28 = arith.constant 0 : index
      %41 = vector.load %arg9[%c0_27, %c0_28] : memref<1x24xf32, #tpu.memory_space<vmem>>, vector<1x24xf32>
      %42 = vector.broadcast %41 : vector<1x24xf32> to vector<2x24xf32>
      %43 = arith.addf %40, %42 : vector<2x24xf32>
      %cst_29 = arith.constant 0.000000e+00 : f32
      %44 = vector.broadcast %cst_29 : f32 to vector<2x24xf32>
      %45 = arith.maximumf %43, %44 : vector<2x24xf32>
      %c0_30 = arith.constant 0 : index
      %c0_31 = arith.constant 0 : index
      %46 = vector.load %arg10[%c0_30, %c0_31] : memref<24x3xf32, #tpu.memory_space<vmem>>, vector<24x3xf32>
      %cst_32 = arith.constant dense<0.000000e+00> : vector<2x3xf32>
      %47 = tpu.matmul %45, %46, %cst_32 {dimension_numbers = #tpu.dot_dimension_numbers<[1], [0], [0], [1], [0, 0, 1, 1], [], []>, precision = #tpu.contract_precision<fp32>} : vector<2x24xf32>, vector<24x3xf32>, vector<2x3xf32> -> vector<2x3xf32>
      %c0_33 = arith.constant 0 : index
      %c0_34 = arith.constant 0 : index
      %48 = vector.load %arg11[%c0_33, %c0_34] : memref<1x3xf32, #tpu.memory_space<vmem>>, vector<1x3xf32>
      %49 = vector.broadcast %48 : vector<1x3xf32> to vector<2x3xf32>
      %50 = arith.addf %47, %49 : vector<2x3xf32>
      %c0_35 = arith.constant 0 : index
      %c0_36 = arith.constant 0 : index
      %51 = vector.load %arg12[%c0_35, %c0_36] : memref<2x3xf32, #tpu.memory_space<vmem>>, vector<2x3xf32>
      tpu.vector_store %arg12[%c0_35, %c0_36], %50 {strides = array<i32>} : memref<2x3xf32, #tpu.memory_space<vmem>>, vector<2x3xf32>,
    } else {
    }
    return
  }
  func.func @transform_0(%arg0: i32, %arg1: i32) -> (i32, i32) {
    %c0_i32 = arith.constant 0 : i32
    %c0_i32_0 = arith.constant 0 : i32
    return %c0_i32, %arg1 : i32, i32
  }
  func.func @transform_1(%arg0: i32, %arg1: i32) -> (i32, i32) {
    %c0_i32 = arith.constant 0 : i32
    %c0_i32_0 = arith.constant 0 : i32
    return %arg1, %c0_i32 : i32, i32
  }
  func.func @transform_2(%arg0: i32, %arg1: i32) -> (i32, i32) {
    %c0_i32 = arith.constant 0 : i32
    %c0_i32_0 = arith.constant 0 : i32
    return %arg0, %c0_i32 : i32, i32
  }
  func.func @transform_3(%arg0: i32, %arg1: i32) -> (i32, i32) {
    %c0_i32 = arith.constant 0 : i32
    %c0_i32_0 = arith.constant 0 : i32
    %c0_i32_1 = arith.constant 0 : i32
    return %c0_i32, %c0_i32_0 : i32, i32
  }
  func.func @transform_4(%arg0: i32, %arg1: i32) -> (i32, i32) {
    %c0_i32 = arith.constant 0 : i32
    %c0_i32_0 = arith.constant 0 : i32
    %c0_i32_1 = arith.constant 0 : i32
    return %c0_i32, %c0_i32_0 : i32, i32
  }
  func.func @transform_5(%arg0: i32, %arg1: i32) -> (i32, i32) {
    %c0_i32 = arith.constant 0 : i32
    %c0_i32_0 = arith.constant 0 : i32
    %c0_i32_1 = arith.constant 0 : i32
    return %c0_i32, %c0_i32_0 : i32, i32
  }
  func.func @transform_6(%arg0: i32, %arg1: i32) -> (i32, i32) {
    %c0_i32 = arith.constant 0 : i32
    %c0_i32_0 = arith.constant 0 : i32
    %c0_i32_1 = arith.constant 0 : i32
    return %c0_i32, %c0_i32_0 : i32, i32
  }
  func.func @transform_7(%arg0: i32, %arg1: i32) -> (i32, i32) {
    %c0_i32 = arith.constant 0 : i32
    %c0_i32_0 = arith.constant 0 : i32
    %c0_i32_1 = arith.constant 0 : i32
    return %c0_i32, %c0_i32_0 : i32, i32
  }
  func.func @transform_8(%arg0: i32, %arg1: i32) -> (i32, i32) {
    %c0_i32 = arith.constant 0 : i32
    %c0_i32_0 = arith.constant 0 : i32
    %c0_i32_1 = arith.constant 0 : i32
    return %c0_i32, %c0_i32_0 : i32, i32
  }
  func.func @transform_9(%arg0: i32, %arg1: i32) -> (i32, i32) {
    %c0_i32 = arith.constant 0 : i32
    %c0_i32_0 = arith.constant 0 : i32
    %c0_i32_1 = arith.constant 0 : i32
    return %c0_i32, %c0_i32_0 : i32, i32
  }
  func.func @transform_10(%arg0: i32, %arg1: i32) -> (i32, i32) {
    %c0_i32 = arith.constant 0 : i32
    %c0_i32_0 = arith.constant 0 : i32
    return %arg0, %c0_i32 : i32, i32
  }
}

</mosaic_0001>

<bundles_post_ra>
// kernel: tpu_custom_call.1
= control target key start
LH: loop header
LB: loop body
LE: loop exit
PB: predicated region body
PF: predicated region fallthrough
CT: control target
= control target key end

     0   :  { %v46_v2 = vlaneseq  ;;  %v2749_v3 = vmov 0.0   ;;  %s3051_s0 = inlined_call_operand.vmem [shape: s32[1,16], index: 0, kind: input, shape index: {}]   ;;  %s3052_s1 = inlined_call_operand.vmem [shape: f32[16,5], index: 1, kind: input, shape index: {}]   ;;  %s3053_s2 = inlined_call_operand.vmem [shape: f32[2,3], index: 2, kind: input, shape index: {}]   ;;  %s3054_s3 = inlined_call_operand.vmem [shape: f32[3,16], index: 3, kind: input, shape index: {}]   ;;  %s3055_s4 = inlined_call_operand.vmem [shape: f32[4,16], index: 4, kind: input, shape index: {}]   ;;  %s3056_s5 = inlined_call_operand.vmem [shape: f32[1,16], index: 5, kind: input, shape index: {}]   ;;  %s3057_s6 = inlined_call_operand.vmem [shape: f32[16,24], index: 6, kind: input, shape index: {}]   ;;  %s3058_s7 = inlined_call_operand.vmem [shape: f32[1,24], index: 7, kind: input, shape index: {}]   ;;  %s3059_s8 = inlined_call_operand.vmem [shape: f32[24,3], index: 8, kind: input, shape index: {}]   ;;  %s3060_s9 = inlined_call_operand.vmem [shape: f32[1,3], index: 9, kind: input, shape index: {}]   ;;  %s3061_s10 = inlined_call_operand.hbm [shape: f32[2,3], index: 10, kind: output, shape index: {}]  }
   0x1   :  { %v43_v0 = vld [vmem:[%s3052_s1 + $0x8] sm:$0xff]  ;;  %v42_v1 = vld [vmem:[%s3052_s1] sm:$0xff]  ;;  %2522 = vmatprep.subr.mxu0 %v2749_v3  ;;  %2529 = vmatprep.subr.mxu1 %v2749_v3 }
   0x2   :  { %v91_v4 = vand.u32 4294901760, %v43_v0  ;;  %v94_v5 = vand.u32 4294901760, %v42_v1  ;;  %v2430_v6 = vld [vmem:[%s3051_s0] ss:$0 sm:$0xff] }
   0x3   :  { %15 = vsyncpa [#allocation4], 0  ;;  %vm2750_vm0 = vmmov 0   ;;  %v47_v7 = vshrl.u32 %v46_v2, 7  ;;  %vm58_vm1 = vcmask 130048   ;;  %vm40_vm3 = vcmask 33792  }
   0x4   :  { %2526 = vmatprep.mubr.msk.f32.mxu0 %vm2750_vm0, %v2749_v3  ;;  %2533 = vmatprep.mubr.msk.f32.mxu1 %vm2750_vm0, %v2749_v3  ;;  %v169_v8 = vsub.f32 %v43_v0, %v91_v4  ;;  %v176_v9 = vsub.f32 %v42_v1, %v94_v5  ;;  %41 = vst.msk [vmem:[#allocation2] sm:$0x3] %vm40_vm3, %v2749_v3  ;;  %v2751_v22 = vmov 4   ;;  %v538_v42 = vld [vmem:[%s3055_s4] sm:$0xf]  ;;  %vm543_vm4 = vcmask 1043456  }
   0x5   :  { %2523 = vmatpush3.msra.mxu0 %v91_v4  ;;  %vm54_vm2 = vcmp.eq.s32.totalorder %v47_v7, %v2430_v6  ;;  %2724 = vset.pattern.permute.xlu0 %v2751_v22  ;;  %v545_v44 = vsel %vm543_vm4, %v538_v42, 0  ;;  %v537_v52 = vld [vmem:[%s3054_s3] sm:$0x7]  ;;  %vm997_vm5 = vcmask 1042432   ;;  %vm539_vm6 = vcmask 31744   ;;  %s2752_s12 = smov [#allocation3]  }
   0x6   :  { %2524 = vmatprep.subr.mxu0 %v2749_v3  ;;  %v170_v10 = vand.u32 4294901760, %v169_v8  ;;  %v177_v11 = vand.u32 4294901760, %v176_v9  ;;  %v2431_v12 = vsel %vm54_vm2, 1.0, %v2749_v3  ;;  %v578_v46 = vand.u32 4294901760, %v545_v44  ;;  %v536_v57 = vld [vmem:[%s3053_s2] sm:$0x3] }
   0x7   :  { %2525 = vmatpush3.msra.mxu0 %v94_v5  ;;  %v60_v13 = vsel %vm58_vm1, %v2431_v12, 0  ;;  %v999_v53 = vsel %vm997_vm5, %v537_v52, 0  ;;  %vm993_vm7 = vcmask 23552   ;;  %vm1938_vm8 = vcmask 195584   ;;  %s2422_s13 = sshll.u32 %s2752_s12, 4  ;;  %s2423_s13 = int_to_ptr.vmem [resolvable:$true] %s2422_s13 }
   0x8   :  { %2536 = vmatprep.subr.mxu0 %v2749_v3  ;;  %v171_v14 = vsub.f32 %v169_v8, %v170_v10  ;;  %v178_v15 = vsub.f32 %v176_v9, %v177_v11  ;;  %v130_v16 = vsub.f32 %v60_v13, %v60_v13  ;;  %v655_v47 = vsub.f32 %v545_v44, %v578_v46  ;;  %v1456_v13 = vld [vmem:[%s3057_s6] sm:$0xff]  ;;  %p2732_p1 = scmp.lt.s32.totalorder %s2423_s13, %s2423_s13 }
   0x9   :  { %v1032_v54 = vand.u32 4294901760, %v999_v53  ;;  %v995_v60 = vsel %vm993_vm7, %v536_v57, 0  ;;  %vm2414_vm9 = vcmask 17408  }
   0xa   :  { %v172_v17 = vand.u32 4294901760, %v171_v14  ;;  %v179_v18 = vand.u32 4294901760, %v178_v15  ;;  %v131_v19 = vand.u32 4294901760, %v130_v16  ;;  %v656_v48 = vand.u32 4294901760, %v655_v47 }
   0xb   :  { %v57_v37 = vld [vmem:[#allocation2] sm:$0x3]  ;;  %v1109_v56 = vsub.f32 %v999_v53, %v1032_v54  ;;  %v1067_v0 = vand.u32 4294901760, %v995_v60  ;;  %v2911_v15 = vand.u32 4294901760, %v1456_v13 }
   0xc   :  { %2530 = vmatpush3.msra.mxu1 %v172_v17  ;;  %v132_v20 = vsub.f32 %v130_v16, %v131_v19  ;;  %v657_v49 = vsub.f32 %v655_v47, %v656_v48 }
   0xd   :  { %2531 = vmatprep.subr.mxu1 %v2749_v3  ;;  %v1110_v62 = vand.u32 4294901760, %v1109_v56  ;;  %v2917_v17 = vsub.f32 %v1456_v13, %v2911_v15 }
   0xe   :  { %2532 = vmatpush3.msra.mxu1 %v179_v18  ;;  %v133_v21 = vand.u32 4294901760, %v132_v20  ;;  %v658_v50 = vand.u32 4294901760, %v657_v49 }
   0xf   :  { %2534 = vmatmul.mubr.msk.f32.vlgmr.msra.gmra.mxu1 %vm58_vm1, %v2431_v12  ;;  %2543 = vmatprep.subr.mxu1 %v2749_v3  ;;  %v1111_v2 = vsub.f32 %v1109_v56, %v1110_v62 }
  0x10   :  { %2527 = vmatmul.mubr.f32.vlgmr.msra.gmra.mxu0 %v133_v21  ;;  %2544 = vmatpush3.msra.mxu1 %v91_v4 }
  0x11   :  { %2537 = vmatpush3.msra.mxu0 %v169_v8  ;;  %2545 = vmatprep.subr.mxu1 %v2749_v3  ;;  %v1112_v7 = vand.u32 4294901760, %v1111_v2 }
  0x12   :  { %2538 = vmatprep.subr.mxu0 %v2749_v3  ;;  %2540 = vmatprep.mubr.msk.f32.mxu0 %vm2750_vm0, %v2749_v3 }
  0x13   :  { %2539 = vmatpush3.msra.mxu0 %v176_v9  ;;  %2546 = vmatpush3.msra.mxu1 %v94_v5 }
  0x14   :  { %2547 = vmatprep.mubr.msk.f32.mxu1 %vm2750_vm0, %v2749_v3  ;;  %2550 = vmatprep.subr.mxu0 %v2749_v3 }
  0x15   :  { %2541 = vmatmul.mubr.f32.vlgmr.msra.gmra.mxu0 %v130_v16  ;;  %2548 = vmatmul.mubr.f32.vlgmr.msra.gmra.mxu1 %v131_v19  ;;  %v1583_v19 = vand.u32 4294901760, %v2917_v17 }
  0x16   :  { %2551 = vmatpush3.msra.mxu0 %v170_v10  ;;  %2557 = vmatprep.subr.mxu1 %v2749_v3 }
  0x17   :  { %2552 = vmatprep.subr.mxu0 %v2749_v3  ;;  %2558 = vmatpush3.msra.mxu1 %v91_v4  ;;  %v1584_v21 = vsub.f32 %v2917_v17, %v1583_v19 }
  0x18   :  { %2553 = vmatpush3.msra.mxu0 %v177_v11  ;;  %2559 = vmatprep.subr.mxu1 %v2749_v3  ;;  %v1457_v11 = vld [vmem:[%s3057_s6 + $0x8] sm:$0xff] }
  0x19   :  { %2554 = vmatprep.mubr.msk.f32.mxu0 %vm2750_vm0, %v2749_v3  ;;  %2560 = vmatpush3.msra.mxu1 %v94_v5  ;;  %v1068_v5 = vsub.f32 %v995_v60, %v1067_v0  ;;  %v1585_v22 = vand.u32 4294901760, %v1584_v21 }
  0x1a   :  { %2561 = vmatprep.mubr.msk.f32.mxu1 %vm2750_vm0, %v2749_v3  ;;  %2555 = vmatmul.mubr.msk.f32.vlgmr.msra.gmra.mxu0 %vm58_vm1, %v2431_v12 }
  0x1b   :  { %2562 = vmatmul.mubr.msk.f32.vlgmr.msra.gmra.mxu1 %vm58_vm1, %v2431_v12  ;;  %2569 = vmatprep.subr.mxu1 %v2749_v3  ;;  %v1069_v8 = vand.u32 4294901760, %v1068_v5  ;;  %v2903_v12 = vand.u32 4294901760, %v1457_v11 }
  0x1c   :  { %2571 = vmatprep.mubr.msk.f32.mxu1 %vm2750_vm0, %v2749_v3  ;;  %2564 = vmatprep.subr.mxu0 %v2749_v3 }
  0x1d   :  { %2566 = vmatprep.mubr.msk.f32.mxu0 %vm2750_vm0, %v2749_v3  ;;  %2565 = vmatpush3.msra.mxu0 %v578_v46  ;;  %v1070_v9 = vsub.f32 %v1068_v5, %v1069_v8  ;;  %v2909_v14 = vsub.f32 %v1457_v11, %v2903_v12 }
  0x1e   :  { %2574 = vmatprep.subr.mxu0 %v2749_v3  ;;  %2570 = vmatpush3.msra.mxu1 %v658_v50 }
  0x1f   :  { %2579 = vmatprep.subr.mxu1 %v2749_v3  ;;  %v1071_v10 = vand.u32 4294901760, %v1070_v9  ;;  %v1576_v16 = vand.u32 4294901760, %v2909_v14  ;;  %v1928_v9 = vld [vmem:[%s3059_s8] sm:$0xff] }
  0x21   :  { %v1577_v18 = vsub.f32 %v2909_v14, %v1576_v16 }
  0x23   :  { %v1578_v20 = vand.u32 4294901760, %v1577_v18 }
  0xcf   :  { %v216_v23 = vpop.f32.mrf.mxu1 }
  0xd0   :  { %v135_v24 = vpop.f32.mrf.mxu0 }
  0xd1   :  { %v2535_v25 = vpop.f32.mrf.mxu1  ;;  %v217_v27 = vadd.f32 %v216_v23, %v135_v24 }
  0xd2   :  { %v2528_v26 = vpop.f32.mrf.mxu0 }
  0xd5   :  { %v292_v28 = vpop.f32.mrf.mxu0  ;;  %v367_v29 = vpop.f32.mrf.mxu1 }
  0xd6   :  { %v293_v30 = vadd.f32 %v292_v28, %v217_v27 }
  0xd7   :  { %v2542_v31 = vpop.f32.mrf.mxu0  ;;  %v2549_v32 = vpop.f32.mrf.mxu1 }
  0xd8   :  { %v368_v33 = vadd.f32 %v367_v29, %v293_v30 }
  0xda   :  { %v444_v34 = vpop.f32.mrf.mxu0 }
  0xdb   :  { %v445_v35 = vadd.f32 %v444_v34, %v368_v33  ;;  %v517_v36 = vpop.f32.mrf.mxu1 }
  0xdc   :  { %v2556_v38 = vpop.f32.mrf.mxu0 }
  0xdd   :  { %v518_v39 = vadd.f32 %v517_v36, %v445_v35  ;;  %v2563_v40 = vpop.f32.mrf.mxu1 }
  0xdf   :  { %v521_v41 = vadd.f32 %v518_v39, %v57_v37 }
  0xe1   :  { %523 = vst.msk [vmem:[#allocation2] sm:$0x3] %vm40_vm3, %v521_v41 }
  0xe8   :  { %v527_v43 = vld [vmem:[#allocation2] sm:$0x3] }
  0xe9   :  { %v528_v45 = vmax.f32 %v527_v43, 1.0 }
  0xeb   :  { %531 = vperm.xlu0 %2724, %v528_v45  }
 0x166   :  { %v532_v51 = vpop.permute.xlu0 %531 }
 0x167   :  { %2725 = vrcp.f32 %v532_v51 }
 0x174   :  { %v2726_v55 = vpop.eup %2725 }
 0x175   :  { %v535_v58 = vmul.f32 %v2726_v55, %v527_v43 }
 0x177   :  { %v541_v59 = vsel %vm539_vm6, %v535_v58, 0 }
 0x178   :  { %v613_v61 = vand.u32 4294901760, %v541_v59 }
 0x17a   :  { %v614_v63 = vsub.f32 %v541_v59, %v613_v61  ;;  %2572 = vmatmul.mubr.f32.vlgmr.msra.gmra.mxu1 %v613_v61 }
 0x17b   :  { %2580 = vmatpush3.msra.mxu1 %v578_v46  ;;  %2581 = vmatprep.mubr.msk.f32.mxu1 %vm2750_vm0, %v2749_v3 }
 0x17c   :  { %v615_v1 = vand.u32 4294901760, %v614_v63  ;;  %2589 = vmatprep.subr.mxu1 %v2749_v3 }
 0x17e   :  { %2582 = vmatmul.mubr.f32.vlgmr.msra.gmra.mxu1 %v615_v1  ;;  %v616_v4 = vsub.f32 %v614_v63, %v615_v1 }
 0x17f   :  { %2590 = vmatpush3.msra.mxu1 %v578_v46  ;;  %2591 = vmatprep.mubr.msk.f32.mxu1 %vm2750_vm0, %v2749_v3 }
 0x180   :  { %v617_v6 = vand.u32 4294901760, %v616_v4  ;;  %2599 = vmatprep.subr.mxu1 %v2749_v3  ;;  %v1930_v4 = vld [vmem:[%s3059_s8 + $0x10] sm:$0xff] }
 0x182   :  { %2567 = vmatmul.mubr.f32.vlgmr.msra.gmra.mxu0 %v617_v6  ;;  %2592 = vmatmul.mubr.f32.vlgmr.msra.gmra.mxu1 %v613_v61  ;;  %v1929_v6 = vld [vmem:[%s3059_s8 + $0x8] sm:$0xff] }
 0x183   :  { %2575 = vmatpush3.msra.mxu0 %v655_v47  ;;  %2576 = vmatprep.mubr.msk.f32.mxu0 %vm2750_vm0, %v2749_v3 }
 0x184   :  { %2584 = vmatprep.subr.mxu0 %v2749_v3  ;;  %2600 = vmatpush3.msra.mxu1 %v1112_v7 }
 0x185   :  { %2601 = vmatprep.mubr.msk.f32.mxu1 %vm2750_vm0, %v2749_v3  ;;  %2609 = vmatprep.subr.mxu1 %v2749_v3 }
 0x186   :  { %2577 = vmatmul.mubr.f32.vlgmr.msra.gmra.mxu0 %v614_v63  ;;  %2602 = vmatmul.mubr.f32.vlgmr.msra.gmra.mxu1 %v1067_v0 }
 0x187   :  { %2585 = vmatpush3.msra.mxu0 %v656_v48  ;;  %2586 = vmatprep.mubr.msk.f32.mxu0 %vm2750_vm0, %v2749_v3 }
 0x188   :  { %2594 = vmatprep.subr.mxu0 %v2749_v3  ;;  %2610 = vmatpush3.msra.mxu1 %v1032_v54 }
 0x189   :  { %2611 = vmatprep.mubr.msk.f32.mxu1 %vm2750_vm0, %v2749_v3  ;;  %2619 = vmatprep.subr.mxu1 %v2749_v3 }
 0x18a   :  { %2587 = vmatmul.mubr.f32.vlgmr.msra.gmra.mxu0 %v613_v61  ;;  %2612 = vmatmul.mubr.f32.vlgmr.msra.gmra.mxu1 %v1069_v8  ;;  %v2975_v8 = vand.u32 4294901760, %v1929_v6 }
 0x18b   :  { %2595 = vmatpush3.msra.mxu0 %v1032_v54  ;;  %2596 = vmatprep.mubr.msk.f32.mxu0 %vm2750_vm0, %v2749_v3 }
 0x18c   :  { %2604 = vmatprep.subr.mxu0 %v2749_v3  ;;  %2620 = vmatpush3.msra.mxu1 %v1032_v54  ;;  %v2984_v11 = vsub.f32 %v1929_v6, %v2975_v8 }
 0x18d   :  { %2621 = vmatprep.mubr.msk.f32.mxu1 %vm2750_vm0, %v2749_v3  ;;  %2631 = vmatprep.subr.mxu1 %v2749_v3 }
 0x18e   :  { %2597 = vmatmul.mubr.f32.vlgmr.msra.gmra.mxu0 %v1071_v10  ;;  %2622 = vmatmul.mubr.f32.vlgmr.msra.gmra.mxu1 %v1067_v0 }
 0x18f   :  { %2605 = vmatpush3.msra.mxu0 %v1109_v56  ;;  %2606 = vmatprep.mubr.msk.f32.mxu0 %vm2750_vm0, %v2749_v3  ;;  %v2435_v56 = vld [vmem:[%s3056_s5] ss:$0 sm:$0xff] }
 0x190   :  { %2614 = vmatprep.subr.mxu0 %v2749_v3  ;;  %2635 = vmatprep.mubr.msk.f32.mxu1 %vm2750_vm0, %v2749_v3 }
 0x191   :  { %2632 = vmatpush3.msra.mxu1 %v1578_v20 }
 0x192   :  { %2607 = vmatmul.mubr.f32.vlgmr.msra.gmra.mxu0 %v1068_v5  ;;  %2633 = vmatprep.subr.mxu1 %v2749_v3  ;;  %v2967_v5 = vand.u32 4294901760, %v1930_v4 }
 0x193   :  { %2615 = vmatpush3.msra.mxu0 %v1110_v62  ;;  %2616 = vmatprep.mubr.msk.f32.mxu0 %vm2750_vm0, %v2749_v3 }
 0x194   :  { %2624 = vmatprep.subr.mxu0 %v2749_v3  ;;  %2634 = vmatpush3.msra.mxu1 %v1585_v22  ;;  %v2973_v7 = vsub.f32 %v1930_v4, %v2967_v5 }
 0x195   :  { %2645 = vmatprep.subr.mxu1 %v2749_v3 }
 0x196   :  { %2617 = vmatmul.mubr.f32.vlgmr.msra.gmra.mxu0 %v1067_v0  ;;  %v2049_v10 = vand.u32 4294901760, %v2973_v7 }
 0x197   :  { %2628 = vmatprep.mubr.msk.f32.mxu0 %vm2750_vm0, %v2749_v3  ;;  %2625 = vmatpush3.msra.mxu0 %v2903_v12 }
 0x198   :  { %2626 = vmatprep.subr.mxu0 %v2749_v3  ;;  %v2050_v13 = vsub.f32 %v2973_v7, %v2049_v10 }
 0x199   :  { %2627 = vmatpush3.msra.mxu0 %v2911_v15 }
 0x19a   :  { %2638 = vmatprep.subr.mxu0 %v2749_v3 }
 0x23a   :  { %v695_v23 = vpop.f32.mrf.mxu1 }
 0x23c   :  { %v2573_v24 = vpop.f32.mrf.mxu1 }
 0x23e   :  { %v843_v25 = vpop.f32.mrf.mxu1 }
 0x240   :  { %v2583_v26 = vpop.f32.mrf.mxu1 }
 0x241   :  { %v2436_v26 = vld [vmem:[%s3058_s7] ss:$0 sm:$0xff] }
 0x242   :  { %v619_v27 = vpop.f32.mrf.mxu0  ;;  %v989_v28 = vpop.f32.mrf.mxu1 }
 0x243   :  { %v696_v31 = vadd.f32 %v695_v23, %v619_v27 }
 0x244   :  { %v2568_v29 = vpop.f32.mrf.mxu0  ;;  %v2593_v30 = vpop.f32.mrf.mxu1 }
 0x246   :  { %v769_v32 = vpop.f32.mrf.mxu0  ;;  %v1149_v33 = vpop.f32.mrf.mxu1 }
 0x247   :  { %v770_v34 = vadd.f32 %v769_v32, %v696_v31 }
 0x248   :  { %v2578_v35 = vpop.f32.mrf.mxu0  ;;  %v2603_v36 = vpop.f32.mrf.mxu1 }
 0x249   :  { %v844_v37 = vadd.f32 %v843_v25, %v770_v34 }
 0x24a   :  { %v917_v38 = vpop.f32.mrf.mxu0  ;;  %v1297_v39 = vpop.f32.mrf.mxu1 }
 0x24b   :  { %v918_v40 = vadd.f32 %v917_v38, %v844_v37 }
 0x24c   :  { %v2588_v41 = vpop.f32.mrf.mxu0  ;;  %v2613_v42 = vpop.f32.mrf.mxu1 }
 0x24d   :  { %v990_v43 = vadd.f32 %v989_v28, %v918_v40 }
 0x24e   :  { %v1073_v44 = vpop.f32.mrf.mxu0  ;;  %v1443_v45 = vpop.f32.mrf.mxu1 }
 0x24f   :  { %v1074_v46 = vadd.f32 %v1073_v44, %v990_v43 }
 0x250   :  { %v2598_v47 = vpop.f32.mrf.mxu0  ;;  %v2623_v48 = vpop.f32.mrf.mxu1 }
 0x251   :  { %v1150_v49 = vadd.f32 %v1149_v33, %v1074_v46 }
 0x252   :  { %v1223_v50 = vpop.f32.mrf.mxu0 }
 0x253   :  { %v1224_v51 = vadd.f32 %v1223_v50, %v1150_v49 }
 0x254   :  { %v2608_v52 = vpop.f32.mrf.mxu0 }
 0x255   :  { %v1298_v53 = vadd.f32 %v1297_v39, %v1224_v51  ;;  %v2437_v51 = vld [vmem:[%s3060_s9] ss:$0 sm:$0xff]  ;;  %s2727_s9 = scalar_lea.vmem %s2423_s13, 32 }
 0x256   :  { %v1371_v54 = vpop.f32.mrf.mxu0  ;;  %p2728_p0 = scmp.ne.s32.totalorder %s2423_s13, %s2727_s9  ;;  %p2733_p2 = scmp.lt.s32.totalorder %s2727_s9, %s2727_s9 }
 0x257   :  { %v1372_v55 = vadd.f32 %v1371_v54, %v1298_v53 }
 0x258   :  { %v2618_v57 = vpop.f32.mrf.mxu0  ;;  %p2734_p3 = por %p2733_p2, %p2732_p1 }
 0x259   :  { %v1444_v58 = vadd.f32 %v1443_v45, %v1372_v55 }
 0x25a   :  { %p2735_p4 = pnand %p2734_p3, %p2728_p0 }
 0x25b   :  { %v1454_v59 = vadd.f32 %v2435_v56, %v1444_v58 }
 0x25d   :  { %v1455_v60 = vmax.f32 %v1454_v59, 0.0 }
 0x25f   :  { %v1466_v61 = vsel %vm58_vm1, %v1455_v60, 0 }
 0x260   :  { %v1535_v62 = vand.u32 4294901760, %v1466_v61 }
 0x262   :  { %v1536_v63 = vsub.f32 %v1466_v61, %v1535_v62  ;;  %2636 = vmatmul.mubr.f32.vlgmr.msra.gmra.mxu1 %v1535_v62 }
 0x263   :  { %2646 = vmatpush3.msra.mxu1 %v2903_v12  ;;  %2649 = vmatprep.mubr.msk.f32.mxu1 %vm2750_vm0, %v2749_v3 }
 0x264   :  { %2647 = vmatprep.subr.mxu1 %v2749_v3  ;;  %v1537_v0 = vand.u32 4294901760, %v1536_v63 }
 0x265   :  { %2648 = vmatpush3.msra.mxu1 %v2911_v15 }
 0x266   :  { %2650 = vmatmul.mubr.f32.vlgmr.msra.gmra.mxu1 %v1537_v0  ;;  %2659 = vmatprep.subr.mxu1 %v2749_v3  ;;  %v1538_v1 = vsub.f32 %v1536_v63, %v1537_v0 }
 0x267   :  { %2660 = vmatpush3.msra.mxu1 %v2903_v12  ;;  %2663 = vmatprep.mubr.msk.f32.mxu1 %vm2750_vm0, %v2749_v3  ;;  %v2986_v12 = vand.u32 4294901760, %v1928_v9 }
 0x268   :  { %2661 = vmatprep.subr.mxu1 %v2749_v3  ;;  %v1539_v2 = vand.u32 4294901760, %v1538_v1 }
 0x269   :  { %2662 = vmatpush3.msra.mxu1 %v2911_v15  ;;  %v2995_v15 = vsub.f32 %v1928_v9, %v2986_v12 }
 0x26a   :  { %2629 = vmatmul.mubr.f32.vlgmr.msra.gmra.mxu0 %v1539_v2  ;;  %2664 = vmatmul.mubr.f32.vlgmr.msra.gmra.mxu1 %v1535_v62 }
 0x26b   :  { %2639 = vmatpush3.msra.mxu0 %v2909_v14  ;;  %2642 = vmatprep.mubr.msk.f32.mxu0 %vm2750_vm0, %v2749_v3  ;;  %v2056_v14 = vand.u32 4294901760, %v2984_v11  ;;  %v2063_v18 = vand.u32 4294901760, %v2995_v15 }
 0x26c   :  { %2640 = vmatprep.subr.mxu0 %v2749_v3  ;;  %2675 = vmatprep.subr.mxu1 %v2749_v3 }
 0x26d   :  { %2641 = vmatpush3.msra.mxu0 %v2917_v17  ;;  %2681 = vmatprep.mubr.msk.f32.mxu1 %vm2750_vm0, %v2749_v3  ;;  %v2057_v17 = vsub.f32 %v2984_v11, %v2056_v14  ;;  %v2064_v20 = vsub.f32 %v2995_v15, %v2063_v18 }
 0x26e   :  { %2652 = vmatprep.subr.mxu0 %v2749_v3  ;;  %2643 = vmatmul.mubr.f32.vlgmr.msra.gmra.mxu0 %v1536_v63 }
 0x26f   :  { %2653 = vmatpush3.msra.mxu0 %v1576_v16  ;;  %2656 = vmatprep.mubr.msk.f32.mxu0 %vm2750_vm0, %v2749_v3  ;;  %v2051_v16 = vand.u32 4294901760, %v2050_v13  ;;  %v2065_v21 = vand.u32 4294901760, %v2064_v20 }
 0x270   :  { %2654 = vmatprep.subr.mxu0 %v2749_v3 }
 0x271   :  { %2655 = vmatpush3.msra.mxu0 %v1583_v19  ;;  %2676 = vmatpush3.msra.mxu1 %v2051_v16  ;;  %v2058_v19 = vand.u32 4294901760, %v2057_v17 }
 0x272   :  { %2657 = vmatmul.mubr.f32.vlgmr.msra.gmra.mxu0 %v1535_v62  ;;  %2666 = vmatprep.subr.mxu0 %v2749_v3 }
 0x273   :  { %2672 = vmatprep.mubr.msk.f32.mxu0 %vm2750_vm0, %v2749_v3  ;;  %2667 = vmatpush3.msra.mxu0 %v2967_v5 }
 0x274   :  { %2668 = vmatprep.subr.mxu0 %v2749_v3  ;;  %2677 = vmatprep.subr.mxu1 %v2749_v3 }
 0x275   :  { %2669 = vmatpush3.msra.mxu0 %v2975_v8  ;;  %2678 = vmatpush3.msra.mxu1 %v2058_v19 }
 0x276   :  { %2670 = vmatprep.subr.mxu0 %v2749_v3  ;;  %2679 = vmatprep.subr.mxu1 %v2749_v3 }
 0x277   :  { %2671 = vmatpush3.msra.mxu0 %v2986_v12  ;;  %2680 = vmatpush3.msra.mxu1 %v2065_v21 }
 0x278   :  { %2684 = vmatprep.subr.mxu0 %v2749_v3  ;;  %2693 = vmatprep.subr.mxu1 %v2749_v3 }
 0x322   :  { %v1622_v22 = vpop.f32.mrf.mxu1 }
 0x324   :  { %v2637_v23 = vpop.f32.mrf.mxu1 }
 0x326   :  { %v1773_v24 = vpop.f32.mrf.mxu1 }
 0x328   :  { %v2651_v25 = vpop.f32.mrf.mxu1 }
 0x32a   :  { %v1541_v27 = vpop.f32.mrf.mxu0  ;;  %v1923_v28 = vpop.f32.mrf.mxu1 }
 0x32b   :  { %v1542_v29 = vadd.f32 %v2436_v26, %v1541_v27 }
 0x32c   :  { %v2630_v30 = vpop.f32.mrf.mxu0  ;;  %v2665_v31 = vpop.f32.mrf.mxu1 }
 0x32d   :  { %v1623_v32 = vadd.f32 %v1622_v22, %v1542_v29 }
 0x32e   :  { %v1698_v33 = vpop.f32.mrf.mxu0 }
 0x32f   :  { %v1699_v34 = vadd.f32 %v1698_v33, %v1623_v32 }
 0x330   :  { %v2644_v35 = vpop.f32.mrf.mxu0 }
 0x331   :  { %v1774_v36 = vadd.f32 %v1773_v24, %v1699_v34 }
 0x332   :  { %v1850_v37 = vpop.f32.mrf.mxu0 }
 0x333   :  { %v1851_v38 = vadd.f32 %v1850_v37, %v1774_v36 }
 0x334   :  { %v2658_v39 = vpop.f32.mrf.mxu0 }
 0x335   :  { %v1924_v40 = vadd.f32 %v1923_v28, %v1851_v38 }
 0x337   :  { %v1927_v41 = vmax.f32 %v1924_v40, 0.0 }
 0x339   :  { %v1940_v42 = vsel %vm1938_vm8, %v1927_v41, 0 }
 0x33a   :  { %v2010_v43 = vand.u32 4294901760, %v1940_v42 }
 0x33c   :  { %v2011_v44 = vsub.f32 %v1940_v42, %v2010_v43  ;;  %2682 = vmatmul.mubr.f32.vlgmr.msra.gmra.mxu1 %v2010_v43 }
 0x33d   :  { %2694 = vmatpush3.msra.mxu1 %v2967_v5  ;;  %2699 = vmatprep.mubr.msk.f32.mxu1 %vm2750_vm0, %v2749_v3 }
 0x33e   :  { %2695 = vmatprep.subr.mxu1 %v2749_v3  ;;  %v2012_v45 = vand.u32 4294901760, %v2011_v44 }
 0x33f   :  { %2696 = vmatpush3.msra.mxu1 %v2975_v8 }
 0x340   :  { %2697 = vmatprep.subr.mxu1 %v2749_v3  ;;  %v2013_v46 = vsub.f32 %v2011_v44, %v2012_v45 }
 0x341   :  { %2698 = vmatpush3.msra.mxu1 %v2986_v12 }
 0x342   :  { %2700 = vmatmul.mubr.f32.vlgmr.msra.gmra.mxu1 %v2012_v45  ;;  %2711 = vmatprep.subr.mxu1 %v2749_v3  ;;  %v2014_v47 = vand.u32 4294901760, %v2013_v46 }
 0x343   :  { %2712 = vmatpush3.msra.mxu1 %v2967_v5  ;;  %2717 = vmatprep.mubr.msk.f32.mxu1 %vm2750_vm0, %v2749_v3 }
 0x344   :  { %2713 = vmatprep.subr.mxu1 %v2749_v3  ;;  %2673 = vmatmul.mubr.f32.vlgmr.msra.gmra.mxu0 %v2014_v47 }
 0x345   :  { %2685 = vmatpush3.msra.mxu0 %v2973_v7  ;;  %2714 = vmatpush3.msra.mxu1 %v2975_v8 }
 0x346   :  { %2686 = vmatprep.subr.mxu0 %v2749_v3  ;;  %2715 = vmatprep.subr.mxu1 %v2749_v3 }
 0x347   :  { %2687 = vmatpush3.msra.mxu0 %v2984_v11  ;;  %2716 = vmatpush3.msra.mxu1 %v2986_v12 }
 0x348   :  { %2688 = vmatprep.subr.mxu0 %v2749_v3  ;;  %2718 = vmatmul.mubr.f32.vlgmr.msra.gmra.mxu1 %v2010_v43 }
 0x349   :  { %2689 = vmatpush3.msra.mxu0 %v2995_v15  ;;  %2690 = vmatprep.mubr.msk.f32.mxu0 %vm2750_vm0, %v2749_v3 }
 0x34a   :  { %2691 = vmatmul.mubr.f32.vlgmr.msra.gmra.mxu0 %v2011_v44  ;;  %2702 = vmatprep.subr.mxu0 %v2749_v3 }
 0x34b   :  { %2703 = vmatpush3.msra.mxu0 %v2049_v10  ;;  %2708 = vmatprep.mubr.msk.f32.mxu0 %vm2750_vm0, %v2749_v3 }
 0x34c   :  { %2704 = vmatprep.subr.mxu0 %v2749_v3 }
 0x34d   :  { %2705 = vmatpush3.msra.mxu0 %v2056_v14 }
 0x34e   :  { %2706 = vmatprep.subr.mxu0 %v2749_v3 }
 0x34f   :  { %2707 = vmatpush3.msra.mxu0 %v2063_v18 }
 0x350   :  { %2709 = vmatmul.mubr.f32.vlgmr.msra.gmra.mxu0 %v2010_v43 }
 0x3fc   :  { %v2102_v48 = vpop.f32.mrf.mxu1 }
 0x3fe   :  { %v2683_v49 = vpop.f32.mrf.mxu1 }
 0x402   :  { %v2256_v50 = vpop.f32.mrf.mxu1 }
 0x404   :  { %v2701_v52 = vpop.f32.mrf.mxu1  ;;  %v2016_v53 = vpop.f32.mrf.mxu0 }
 0x405   :  { %v2017_v54 = vadd.f32 %v2437_v51, %v2016_v53 }
 0x406   :  { %v2674_v55 = vpop.f32.mrf.mxu0 }
 0x407   :  { %v2103_v56 = vadd.f32 %v2102_v48, %v2017_v54 }
 0x408   :  { %v2410_v57 = vpop.f32.mrf.mxu1 }
 0x40a   :  { %v2180_v58 = vpop.f32.mrf.mxu0  ;;  %v2719_v59 = vpop.f32.mrf.mxu1 }
 0x40b   :  { %v2181_v3 = vadd.f32 %v2180_v58, %v2103_v56 }
 0x40c   :  { %v2692_v60 = vpop.f32.mrf.mxu0 }
 0x40d   :  { %v2257_v61 = vadd.f32 %v2256_v50, %v2181_v3 }
 0x410   :  { %v2336_v62 = vpop.f32.mrf.mxu0 }
 0x411   :  { %v2337_v63 = vadd.f32 %v2336_v62, %v2257_v61 }
 0x412   :  { %v2710_v0 = vpop.f32.mrf.mxu0 }
 0x413   :  { %v2411_v1 = vadd.f32 %v2410_v57, %v2337_v63 }
 0x415   :  { %2415 = vst.msk [vmem:[#allocation3] sm:$0x3] %vm2414_vm9, %v2411_v1 }
 0x416   :  { %2738 = shalt.err (!%p2735_p4)
}
 0x417   :  { %2425 = dma.vmem_to_hbm [thread:$0]  %s2423_s13, 32, %s3061_s10, [#allocation4]  }
 0x418   :  { %2747 = dma.done.wait [#allocation4], 32  }
 0x419   :  { %2748 = vsyncadd [#allocation4], 4294967264 }
 0x41a   :  { %2429 = vsyncpa [#allocation4], 1 }

</bundles_post_ra>
